<compile_context>
chip_gen: v7x
topology: tpu7x:2x2x1
jax: 0.10.0
libtpu: 0.0.40
codegen_flags: <defaults>
</compile_context>

<pallas_src>
import jax
import jax.numpy as jnp
from jax.experimental import pallas as pl
from jax.experimental.pallas import tpu as pltpu


def _round_up(x, m):
    return ((x + m - 1) // m) * m


def _mlp_kernel(x_ref, w1_ref, b1_ref, w2_ref, b2_ref, w3_ref, b3_ref, o_ref):
    """Fused fc1 -> relu -> fc2 -> relu -> fc3 for one batch tile.

    x tile: (TM, obs) f32 streamed from HBM; weights bf16, VMEM-resident
    (constant index_maps); biases f32 (1, out).  All matmuls accumulate in f32
    on the MXU; bias + ReLU epilogues stay f32 (v5e's VPU has no bf16).
    """
    # Cast the streamed x tile to bf16 in VMEM (no extra HBM pass).
    x = x_ref[...].astype(w1_ref.dtype)

    # fc1 + ReLU (f32 epilogue)
    h1 = jnp.dot(x, w1_ref[...], preferred_element_type=jnp.float32) + b1_ref[...]
    h1 = jnp.maximum(h1, 0.0)

    # fc2 + ReLU
    h2 = (
        jnp.dot(h1.astype(w2_ref.dtype), w2_ref[...],
                preferred_element_type=jnp.float32)
        + b2_ref[...]
    )
    h2 = jnp.maximum(h2, 0.0)

    # fc3 (q_values over 128-lane-padded output, no activation)
    q = (
        jnp.dot(h2.astype(w3_ref.dtype), w3_ref[...],
                preferred_element_type=jnp.float32)
        + b3_ref[...]
    )
    o_ref[...] = q.astype(o_ref.dtype)


def prepare_params(params):
    """One-time parameter prep (do NOT call per forward).

    * Weights -> bf16 (native MXU rate, half the HBM/VMEM bytes).
    * fc3 weight/bias zero-padded to a multiple of 128 output lanes so the
      kernel's stores are full-width `vst` instead of masked partial stores.
    * Biases kept f32, shaped (1, out) for sublane broadcast.
    """
    w1, b1, w2, b2, w3, b3 = params
    hidden = w1.shape[1]
    n_actions = w3.shape[1]
    out_pad = _round_up(max(n_actions, 128), 128)

    if out_pad != n_actions:
        w3p = jnp.zeros((hidden, out_pad), w3.dtype).at[:, :n_actions].set(w3)
        b3p = jnp.zeros((1, out_pad), b3.dtype).at[:, :n_actions].set(b3)
    else:
        w3p, b3p = w3, b3

    return {
        "w1": w1.astype(jnp.bfloat16),
        "b1": b1.astype(jnp.float32).reshape(1, -1),
        "w2": w2.astype(jnp.bfloat16),
        "b2": b2.astype(jnp.float32).reshape(1, -1),
        "w3": w3p.astype(jnp.bfloat16),
        "b3": b3p.astype(jnp.float32).reshape(1, -1),
        "n_actions": int(n_actions),  # static metadata
    }


def mlp_forward(observation, prepared, *, tm=2048, out_dtype=jnp.float32,
                return_padded=False):
    """observation (B, obs_size) f32 -> q_values (B, n_actions) in `out_dtype`.

    `prepared` is the output of `prepare_params` (weights already bf16, fc3
    padded to 128 lanes).  No per-call HBM passes over weights or activations
    happen outside the pallas_call.
    """
    w1, b1 = prepared["w1"], prepared["b1"]
    w2, b2 = prepared["w2"], prepared["b2"]
    w3, b3 = prepared["w3"], prepared["b3"]
    n_actions = prepared["n_actions"]

    batch, obs = observation.shape
    assert obs == w1.shape[0], "observation_size mismatch with fc1"
    hidden = w1.shape[1]
    out_pad = w3.shape[1]

    # --- batch tiling: ragged last tile, multiple of 16 sublanes -------------
    # When the batch is large, cap the tile at ~ceil(batch/2) so the grid has
    # >= 2 steps and the "parallel" axis can shard across v7x's 2 TensorCores.
    target = -(-batch // 2) if batch >= 32 else batch
    tile_m = min(tm, _round_up(max(target, 1), 16))
    grid_m = pl.cdiv(batch, tile_m)

    elt_in = jnp.dtype(observation.dtype).itemsize
    elt_out = jnp.dtype(out_dtype).itemsize
    flops = 2 * batch * (obs * hidden + hidden * hidden + hidden * out_pad)
    bytes_accessed = (
        batch * obs * elt_in                                        # x in
        + (obs * hidden + hidden * hidden + hidden * out_pad) * 2   # bf16 weights
        + (2 * hidden + out_pad) * 4                                # f32 biases
        + batch * out_pad * elt_out                                 # out
    )

    out = pl.pallas_call(
        _mlp_kernel,
        out_shape=jax.ShapeDtypeStruct((batch, out_pad), out_dtype),
        grid=(grid_m,),
        in_specs=[
            # streamed batch tile of activations (ragged last tile is masked)
            pl.BlockSpec((tile_m, obs), lambda i: (i, 0)),
            # VMEM-resident weights/biases (constant index maps -> DMA'd once)
            pl.BlockSpec((obs, hidden), lambda i: (0, 0)),
            pl.BlockSpec((1, hidden), lambda i: (0, 0)),
            pl.BlockSpec((hidden, hidden), lambda i: (0, 0)),
            pl.BlockSpec((1, hidden), lambda i: (0, 0)),
            pl.BlockSpec((hidden, out_pad), lambda i: (0, 0)),
            pl.BlockSpec((1, out_pad), lambda i: (0, 0)),
        ],
        out_specs=pl.BlockSpec((tile_m, out_pad), lambda i: (i, 0)),
        compiler_params=pltpu.CompilerParams(
            dimension_semantics=("parallel",),
            vmem_limit_bytes=48 * 1024 * 1024,
        ),
        cost_estimate=pl.CostEstimate(
            flops=int(flops), transcendentals=0, bytes_accessed=int(bytes_accessed)
        ),
    )(observation, w1, b1, w2, b2, w3, b3)

    if return_padded:
        # Hand the lane-dense (B, 128) buffer to the consumer (argmax / gather)
        # and let it slice lazily, avoiding an extra HBM pass.
        return out
    return out[:, :n_actions]


def init_mlp_params(key, observation_size, hidden_size, n_actions):
    """Deterministic init mirroring nn.Linear's U(-1/sqrt(fan_in), 1/sqrt(fan_in)).

    Weights stored transposed relative to PyTorch: (in, out); biases (1, out).
    """
    keys = jax.random.split(key, 6)

    def linear(kw, kb, fan_in, fan_out):
        bound = 1.0 / jnp.sqrt(jnp.float32(fan_in))
        w = jax.random.uniform(kw, (fan_in, fan_out), jnp.float32, -bound, bound)
        b = jax.random.uniform(kb, (1, fan_out), jnp.float32, -bound, bound)
        return w, b

    w1, b1 = linear(keys[0], keys[1], observation_size, hidden_size)
    w2, b2 = linear(keys[2], keys[3], hidden_size, hidden_size)
    w3, b3 = linear(keys[4], keys[5], hidden_size, n_actions)
    return (w1, b1, w2, b2, w3, b3)


def _reference_forward(observation, params, use_bf16=True):
    """Pure-JAX reference mirroring the kernel's bf16-operand / f32-accum math."""
    w1, b1, w2, b2, w3, b3 = params
    f32 = jnp.float32
    if use_bf16:
        c = lambda a: a.astype(jnp.bfloat16).astype(f32)
    else:
        c = lambda a: a.astype(f32)
    h = jnp.maximum(c(observation) @ c(w1) + b1, 0.0)
    h = jnp.maximum(c(h) @ c(w2) + b2, 0.0)
    return c(h) @ c(w3) + b3


if __name__ == "__main__":
    key = jax.random.PRNGKey(0)
    k_obs, k_params, k_obs2 = jax.random.split(key, 3)

    # Small shapes consistent with the module's forward pass.
    batch = 2
    observation_size = 64
    hidden_size = 128
    n_actions = 16

    observation = jax.random.normal(
        k_obs, (batch, observation_size), dtype=jnp.float32
    )
    params = init_mlp_params(k_params, observation_size, hidden_size, n_actions)
    prepared = prepare_params(params)   # one-time prep (bf16 cast + 128-lane pad)

    q_values = mlp_forward(observation, prepared)
    jax.block_until_ready(q_values)
    assert q_values.shape == (batch, n_actions)

    # bf16-faithful reference (same operand rounding, f32 accumulation).
    ref = _reference_forward(observation, params, use_bf16=True)
    assert jnp.allclose(q_values, ref, atol=1e-3, rtol=1e-3), "mismatch vs reference"

    # Also sanity-check against the exact f32 math with a loose bf16 tolerance.
    ref_f32 = _reference_forward(observation, params, use_bf16=False)
    assert jnp.allclose(q_values, ref_f32, atol=5e-2, rtol=5e-2), "far from f32 reference"

    # Exercise the ragged multi-tile path (batch not a multiple of the tile,
    # grid >= 2): OOB rows of the last tile must be masked correctly.
    batch2 = 50
    observation2 = jax.random.normal(
        k_obs2, (batch2, observation_size), dtype=jnp.float32
    )
    q2 = mlp_forward(observation2, prepared)
    jax.block_until_ready(q2)
    assert q2.shape == (batch2, n_actions)
    ref2 = _reference_forward(observation2, params, use_bf16=True)
    assert jnp.allclose(q2, ref2, atol=1e-3, rtol=1e-3), "mismatch on ragged batch"

    print("KERNEL_OK")
</pallas_src>

<mosaic_0001>
module attributes {stable_mosaic.version = 11 : i64} {
  func.func @_mlp_kernel(%arg0: i32, %arg1: memref<16x64xf32, #tpu.memory_space<vmem>>, %arg2: memref<64x128xbf16, #tpu.memory_space<vmem>>, %arg3: memref<1x128xf32, #tpu.memory_space<vmem>>, %arg4: memref<128x128xbf16, #tpu.memory_space<vmem>>, %arg5: memref<1x128xf32, #tpu.memory_space<vmem>>, %arg6: memref<128x128xbf16, #tpu.memory_space<vmem>>, %arg7: memref<1x128xf32, #tpu.memory_space<vmem>>, %arg8: memref<16x128xf32, #tpu.memory_space<vmem>>) attributes {dimension_semantics = [#tpu.dimension_semantics<parallel>], iteration_bounds = array<i64: 1>, scalar_prefetch = 0 : i64, scratch_operands = 0 : i64, tpu.core_type = #tpu.core_type<tc>, window_params = [{transform_indices = @transform_0, window_bounds = array<i64: 16, 64>}, {pipeline_mode = #tpu.pipeline_mode<synchronous>, transform_indices = @transform_1, window_bounds = array<i64: 64, 128>}, {pipeline_mode = #tpu.pipeline_mode<synchronous>, transform_indices = @transform_2, window_bounds = array<i64: 1, 128>}, {pipeline_mode = #tpu.pipeline_mode<synchronous>, transform_indices = @transform_3, window_bounds = array<i64: 128, 128>}, {pipeline_mode = #tpu.pipeline_mode<synchronous>, transform_indices = @transform_4, window_bounds = array<i64: 1, 128>}, {pipeline_mode = #tpu.pipeline_mode<synchronous>, transform_indices = @transform_5, window_bounds = array<i64: 128, 128>}, {pipeline_mode = #tpu.pipeline_mode<synchronous>, transform_indices = @transform_6, window_bounds = array<i64: 1, 128>}, {transform_indices = @transform_7, window_bounds = array<i64: 16, 128>}]} {
    %c0 = arith.constant 0 : index
    %c0_0 = arith.constant 0 : index
    %0 = vector.load %arg1[%c0, %c0_0] : memref<16x64xf32, #tpu.memory_space<vmem>>, vector<16x64xf32>
    %1 = arith.truncf %0 : vector<16x64xf32> to vector<16x64xbf16>
    %c0_1 = arith.constant 0 : index
    %c0_2 = arith.constant 0 : index
    %2 = vector.load %arg2[%c0_1, %c0_2] : memref<64x128xbf16, #tpu.memory_space<vmem>>, vector<64x128xbf16>
    %cst = arith.constant dense<0.000000e+00> : vector<16x128xf32>
    %3 = tpu.matmul %1, %2, %cst {dimension_numbers = #tpu.dot_dimension_numbers<[1], [0], [0], [1], [0, 0, 1, 1], [], []>} : vector<16x64xbf16>, vector<64x128xbf16>, vector<16x128xf32> -> vector<16x128xf32>
    %c0_3 = arith.constant 0 : index
    %c0_4 = arith.constant 0 : index
    %4 = vector.load %arg3[%c0_3, %c0_4] : memref<1x128xf32, #tpu.memory_space<vmem>>, vector<1x128xf32>
    %5 = vector.broadcast %4 : vector<1x128xf32> to vector<16x128xf32>
    %6 = arith.addf %3, %5 : vector<16x128xf32>
    %cst_5 = arith.constant 0.000000e+00 : f32
    %7 = vector.broadcast %cst_5 : f32 to vector<16x128xf32>
    %8 = arith.maximumf %6, %7 : vector<16x128xf32>
    %9 = arith.truncf %8 : vector<16x128xf32> to vector<16x128xbf16>
    %c0_6 = arith.constant 0 : index
    %c0_7 = arith.constant 0 : index
    %10 = vector.load %arg4[%c0_6, %c0_7] : memref<128x128xbf16, #tpu.memory_space<vmem>>, vector<128x128xbf16>
    %cst_8 = arith.constant dense<0.000000e+00> : vector<16x128xf32>
    %11 = tpu.matmul %9, %10, %cst_8 {dimension_numbers = #tpu.dot_dimension_numbers<[1], [0], [0], [1], [0, 0, 1, 1], [], []>} : vector<16x128xbf16>, vector<128x128xbf16>, vector<16x128xf32> -> vector<16x128xf32>
    %c0_9 = arith.constant 0 : index
    %c0_10 = arith.constant 0 : index
    %12 = vector.load %arg5[%c0_9, %c0_10] : memref<1x128xf32, #tpu.memory_space<vmem>>, vector<1x128xf32>
    %13 = vector.broadcast %12 : vector<1x128xf32> to vector<16x128xf32>
    %14 = arith.addf %11, %13 : vector<16x128xf32>
    %cst_11 = arith.constant 0.000000e+00 : f32
    %15 = vector.broadcast %cst_11 : f32 to vector<16x128xf32>
    %16 = arith.maximumf %14, %15 : vector<16x128xf32>
    %17 = arith.truncf %16 : vector<16x128xf32> to vector<16x128xbf16>
    %c0_12 = arith.constant 0 : index
    %c0_13 = arith.constant 0 : index
    %18 = vector.load %arg6[%c0_12, %c0_13] : memref<128x128xbf16, #tpu.memory_space<vmem>>, vector<128x128xbf16>
    %cst_14 = arith.constant dense<0.000000e+00> : vector<16x128xf32>
    %19 = tpu.matmul %17, %18, %cst_14 {dimension_numbers = #tpu.dot_dimension_numbers<[1], [0], [0], [1], [0, 0, 1, 1], [], []>} : vector<16x128xbf16>, vector<128x128xbf16>, vector<16x128xf32> -> vector<16x128xf32>
    %c0_15 = arith.constant 0 : index
    %c0_16 = arith.constant 0 : index
    %20 = vector.load %arg7[%c0_15, %c0_16] : memref<1x128xf32, #tpu.memory_space<vmem>>, vector<1x128xf32>
    %21 = vector.broadcast %20 : vector<1x128xf32> to vector<16x128xf32>
    %22 = arith.addf %19, %21 : vector<16x128xf32>
    %c0_17 = arith.constant 0 : index
    %c0_18 = arith.constant 0 : index
    %23 = vector.load %arg8[%c0_17, %c0_18] : memref<16x128xf32, #tpu.memory_space<vmem>>, vector<16x128xf32>
    tpu.vector_store %arg8[%c0_17, %c0_18], %22 {strides = array<i32>} : memref<16x128xf32, #tpu.memory_space<vmem>>, vector<16x128xf32>,
    return
  }
  func.func @transform_0(%arg0: i32) -> (i32, i32) {
    %c0_i32 = arith.constant 0 : i32
    %c0_i32_0 = arith.constant 0 : i32
    return %arg0, %c0_i32 : i32, i32
  }
  func.func @transform_1(%arg0: i32) -> (i32, i32) {
    %c0_i32 = arith.constant 0 : i32
    %c0_i32_0 = arith.constant 0 : i32
    %c0_i32_1 = arith.constant 0 : i32
    return %c0_i32, %c0_i32_0 : i32, i32
  }
  func.func @transform_2(%arg0: i32) -> (i32, i32) {
    %c0_i32 = arith.constant 0 : i32
    %c0_i32_0 = arith.constant 0 : i32
    %c0_i32_1 = arith.constant 0 : i32
    return %c0_i32, %c0_i32_0 : i32, i32
  }
  func.func @transform_3(%arg0: i32) -> (i32, i32) {
    %c0_i32 = arith.constant 0 : i32
    %c0_i32_0 = arith.constant 0 : i32
    %c0_i32_1 = arith.constant 0 : i32
    return %c0_i32, %c0_i32_0 : i32, i32
  }
  func.func @transform_4(%arg0: i32) -> (i32, i32) {
    %c0_i32 = arith.constant 0 : i32
    %c0_i32_0 = arith.constant 0 : i32
    %c0_i32_1 = arith.constant 0 : i32
    return %c0_i32, %c0_i32_0 : i32, i32
  }
  func.func @transform_5(%arg0: i32) -> (i32, i32) {
    %c0_i32 = arith.constant 0 : i32
    %c0_i32_0 = arith.constant 0 : i32
    %c0_i32_1 = arith.constant 0 : i32
    return %c0_i32, %c0_i32_0 : i32, i32
  }
  func.func @transform_6(%arg0: i32) -> (i32, i32) {
    %c0_i32 = arith.constant 0 : i32
    %c0_i32_0 = arith.constant 0 : i32
    %c0_i32_1 = arith.constant 0 : i32
    return %c0_i32, %c0_i32_0 : i32, i32
  }
  func.func @transform_7(%arg0: i32) -> (i32, i32) {
    %c0_i32 = arith.constant 0 : i32
    %c0_i32_0 = arith.constant 0 : i32
    return %arg0, %c0_i32 : i32, i32
  }
}

</mosaic_0001>

<bundles_post_ra>
// kernel: tpu_custom_call.1
= control target key start
LH: loop header
LB: loop body
LE: loop exit
PB: predicated region body
PF: predicated region fallthrough
CT: control target
= control target key end

     0   :  { %12 = vsyncpa [#allocation3], 0  ;;  %s837_s0 = inlined_call_operand.hbm [shape: f32[2,64], index: 0, kind: input, shape index: {}]   ;;  %s838_s1 = inlined_call_operand.hbm [shape: bf16[64,128], index: 1, kind: input, shape index: {}]   ;;  %s839_s2 = inlined_call_operand.vmem [shape: f32[1,128], index: 2, kind: input, shape index: {}]   ;;  %s840_s3 = inlined_call_operand.hbm [shape: bf16[128,128], index: 3, kind: input, shape index: {}]   ;;  %s841_s4 = inlined_call_operand.vmem [shape: f32[1,128], index: 4, kind: input, shape index: {}]   ;;  %s842_s5 = inlined_call_operand.hbm [shape: bf16[128,128], index: 5, kind: input, shape index: {}]   ;;  %s843_s6 = inlined_call_operand.vmem [shape: f32[1,128], index: 6, kind: input, shape index: {}]   ;;  %s844_s7 = inlined_call_operand.hbm [shape: f32[2,128], index: 7, kind: output, shape index: {}]  }
   0x1   :  { %13 = vsyncpa [#allocation6], 0 }
   0x2   :  { %14 = vsyncpa [#allocation9], 0 }
   0x3   :  { %15 = vsyncpa [#allocation4], 0 }
   0x4   :  { %20 = vsyncadd [#allocation3], 224  ;;  %s669_s24 = smov [#allocation5]   ;;  %s551_s28 = scalar_lea.hbm %s838_s1, 512 }
   0x5   :  { %s33_s25 = sshll.u32 %s669_s24, 4  ;;  %p552_p0 = scmp.ne.s32.totalorder %s838_s1, %s551_s28  ;;  %s34_s25 = int_to_ptr.vmem [resolvable:$true] %s33_s25 }
   0x6   :  { %p555_p1 = scmp.lt.u32.totalorder %s551_s28, %s838_s1 }
   0x8   :  { %p557_p2 = pnand %p555_p1, %p552_p0 }
   0xa   :  { %560 = shalt.err (!%p557_p2)
}
   0xb   :  { %s561_s10 = scalar_lea.vmem %s34_s25, 512  ;;  %p566_p4 = scmp.lt.s32.totalorder %s34_s25, %s34_s25 }
   0xc   :  { %p562_p3 = scmp.ne.s32.totalorder %s34_s25, %s561_s10  ;;  %p567_p5 = scmp.lt.s32.totalorder %s561_s10, %s561_s10 }
   0xe   :  { %p568_p6 = por %p567_p5, %p566_p4 }
  0x10   :  { %p569_p7 = pnand %p568_p6, %p562_p3 }
  0x12   :  { %572 = shalt.err (!%p569_p7)
}
  0x13   :  { %s670_s11 = smov 64   ;;  %s671_s12 = smov 4  }
  0x14   :  { %39 = dma.hbm_to_vmem [thread:$0]  %s838_s1, 512, %s34_s25, [#allocation6], %s670_s11, %s670_s11, %s671_s12  }
  0x15   :  { %s672_s15 = smov [#allocation2]   ;;  %s573_s19 = scalar_lea.hbm %s837_s0, 32 }
  0x16   :  { %s21_s16 = sshll.u32 %s672_s15, 4  ;;  %p574_p8 = scmp.ne.s32.totalorder %s837_s0, %s573_s19  ;;  %s22_s16 = int_to_ptr.vmem [resolvable:$true] %s21_s16 }
  0x17   :  { %p577_p9 = scmp.lt.u32.totalorder %s573_s19, %s837_s0 }
  0x19   :  { %p579_p10 = pnand %p577_p9, %p574_p8 }
  0x1b   :  { %582 = shalt.err (!%p579_p10)
}
  0x1c   :  { %s583_s24 = scalar_lea.vmem %s22_s16, 32  ;;  %s587_s1 = scalar_lea.vmem %s22_s16, 256 }
  0x1d   :  { %p584_p11 = scmp.ne.s32.totalorder %s22_s16, %s583_s24  ;;  %p588_p12 = scmp.lt.s32.totalorder %s22_s16, %s22_s16 }
  0x1e   :  { %p589_p13 = scmp.lt.s32.totalorder %s587_s1, %s583_s24 }
  0x20   :  { %p590_p0 = por %p589_p13, %p588_p12 }
  0x22   :  { %p591_p1 = pnand %p590_p0, %p584_p11 }
  0x24   :  { %594 = shalt.err (!%p591_p1)
}
  0x25   :  { %s673_s25 = smov 32   ;;  %s674_s26 = smov 2  }
  0x26   :  { %27 = dma.hbm_to_vmem [thread:$0]  %s837_s0, 32, %s22_s16, [#allocation3], %s673_s25, %s673_s25, %s674_s26  }
  0x27   :  { %s675_s29 = smov [#allocation7]   ;;  %s676_s8 = smov [#allocation8]  }
  0x28   :  { %s47_s30 = sshll.u32 %s675_s29, 4  ;;  %s61_s9 = sshll.u32 %s676_s8, 4  ;;  %s48_s30 = int_to_ptr.vmem [resolvable:$true] %s47_s30  ;;  %s750_s9 = int_to_ptr.vmem [resolvable:$true] %s61_s9 }
  0x29   :  { %s595_s14 = scalar_lea.hbm %s840_s3, 1024 }
  0x2a   :  { %p596_p2 = scmp.ne.s32.totalorder %s840_s3, %s595_s14  ;;  %p599_p3 = scmp.lt.u32.totalorder %s595_s14, %s840_s3 }
  0x2c   :  { %p601_p4 = pnand %p599_p3, %p596_p2 }
  0x2e   :  { %604 = shalt.err (!%p601_p4)
}
  0x2f   :  { %s605_s0 = scalar_lea.vmem %s48_s30, 1024  ;;  %p610_p6 = scmp.lt.s32.totalorder %s48_s30, %s48_s30 }
  0x30   :  { %p606_p5 = scmp.ne.s32.totalorder %s48_s30, %s605_s0  ;;  %p611_p7 = scmp.lt.s32.totalorder %s605_s0, %s605_s0 }
  0x32   :  { %p612_p8 = por %p611_p7, %p610_p6 }
  0x34   :  { %p613_p9 = pnand %p612_p8, %p606_p5 }
  0x36   :  { %616 = shalt.err (!%p613_p9)
}
  0x37   :  { %53 = dma.hbm_to_vmem [thread:$0]  %s840_s3, 1024, %s48_s30, [#allocation6], %s670_s11, %s670_s11, %s671_s12  }
  0x38   :  { %s617_s23 = scalar_lea.hbm %s842_s5, 1024 }
  0x39   :  { %p618_p10 = scmp.ne.s32.totalorder %s842_s5, %s617_s23  ;;  %p621_p11 = scmp.lt.u32.totalorder %s617_s23, %s842_s5 }
  0x3b   :  { %p623_p12 = pnand %p621_p11, %p618_p10 }
  0x3d   :  { %626 = shalt.err (!%p623_p12)
}
  0x3e   :  { %s627_s29 = scalar_lea.vmem %s750_s9, 1024  ;;  %p632_p0 = scmp.lt.s32.totalorder %s750_s9, %s750_s9 }
  0x3f   :  { %p628_p13 = scmp.ne.s32.totalorder %s750_s9, %s627_s29  ;;  %p633_p1 = scmp.lt.s32.totalorder %s627_s29, %s627_s29 }
  0x41   :  { %p634_p2 = por %p633_p1, %p632_p0 }
  0x43   :  { %p635_p3 = pnand %p634_p2, %p628_p13 }
  0x45   :  { %638 = shalt.err (!%p635_p3)
}
  0x46   :  { %67 = dma.hbm_to_vmem [thread:$0]  %s842_s5, 1024, %s750_s9, [#allocation9], %s670_s11, %s670_s11, %s671_s12  }
  0x47   :  { %661 = dma.done.wait [#allocation3], 256  }
  0x48   :  { %662 = vsyncadd [#allocation3], 4294967040 }
  0x49   :  { %663 = dma.done.wait [#allocation6], 1536  }
  0x4a   :  { %664 = vsyncadd [#allocation6], 4294965760 }
  0x4b   :  { %665 = dma.done.wait [#allocation9], 1024  }
  0x4c   :  { %666 = vsyncadd [#allocation9], 4294966272  ;;  %v677_v0 = vmov 0.0   ;;  %vm678_vm0 = vmmov 0   ;;  %v531_v1 = vld [vmem:[#allocation5] sm:$0xff]   ;;  %v532_v2 = vld [vmem:[#allocation5 + $0x8] sm:$0xff]  }
  0x4d   :  { %468 = vmatprep.subr.bf16.mxu0 %v677_v0  ;;  %476 = vmatprep.mubr.msk.bf16.mxu0 %vm678_vm0, %v677_v0  ;;  %v535_v3 = vld [vmem:[#allocation7] sm:$0xff]   ;;  %v533_v4 = vld [vmem:[#allocation5 + $0x10] sm:$0xff]   ;;  %v536_v5 = vld [vmem:[#allocation7 + $0x8] sm:$0xff]   ;;  %vm125_vm1 = vcmask 523264  }
  0x4e   :  { %480 = vmatprep.subr.bf16.mxu1 %v677_v0  ;;  %496 = vmatprep.mubr.msk.bf16.mxu1 %vm678_vm0, %v677_v0  ;;  %v534_v6 = vld [vmem:[#allocation5 + $0x18] sm:$0xff]   ;;  %v83_v7 = vld [vmem:[#allocation2] sm:$0xff]  ;;  %v539_v12 = vld [vmem:[#allocation7 + $0x20] sm:$0xff]  }
  0x4f   :  { %469 = vmatpush3.bf16.msra.mxu0 %v531_v1  ;;  %481 = vmatpush3.bf16.msra.mxu1 %v535_v3  ;;  %v84_v8 = vld [vmem:[#allocation2 + $0x8] sm:$0xff]  ;;  %v537_v9 = vld [vmem:[#allocation7 + $0x10] sm:$0xff]   ;;  %v540_v13 = vld [vmem:[#allocation7 + $0x28] sm:$0xff]  }
  0x50   :  { %470 = vmatprep.subr.bf16.mxu0 %v677_v0  ;;  %482 = vmatprep.subr.bf16.mxu1 %v677_v0  ;;  %v85_v10 = vpack.c.bf16 %v84_v8, %v83_v7  ;;  %v538_v11 = vld [vmem:[#allocation7 + $0x18] sm:$0xff]   ;;  %v541_v14 = vld [vmem:[#allocation7 + $0x30] sm:$0xff]   ;;  %v543_v16 = vld [vmem:[#allocation8] sm:$0xff]  }
  0x51   :  { %v542_v15 = vld [vmem:[#allocation7 + $0x38] sm:$0xff]   ;;  %v544_v17 = vld [vmem:[#allocation8 + $0x8] sm:$0xff]   ;;  %v545_v18 = vld [vmem:[#allocation8 + $0x10] sm:$0xff]  }
  0x52   :  { %v546_v19 = vld [vmem:[#allocation8 + $0x18] sm:$0xff]   ;;  %v547_v20 = vld [vmem:[#allocation8 + $0x20] sm:$0xff]   ;;  %v548_v21 = vld [vmem:[#allocation8 + $0x28] sm:$0xff]  }
  0x53   :  { %471 = vmatpush3.bf16.msra.mxu0 %v532_v2  ;;  %483 = vmatpush3.bf16.msra.mxu1 %v536_v5  ;;  %v421_v22 = vld [vmem:[%s839_s2] ss:$0 sm:$0xff]  ;;  %v550_v33 = vld [vmem:[#allocation8 + $0x38] sm:$0xff]  }
  0x54   :  { %472 = vmatprep.subr.bf16.mxu0 %v677_v0  ;;  %484 = vmatprep.subr.bf16.mxu1 %v677_v0  ;;  %v549_v32 = vld [vmem:[#allocation8 + $0x30] sm:$0xff]  }
  0x55   :  { %v427_v34 = vld [vmem:[%s841_s4] ss:$0 sm:$0xff] }
  0x56   :  { %v436_v44 = vld [vmem:[%s843_s6] ss:$0 sm:$0xff] }
  0x57   :  { %473 = vmatpush3.bf16.msra.mxu0 %v533_v4  ;;  %485 = vmatpush3.bf16.msra.mxu1 %v537_v9 }
  0x58   :  { %474 = vmatprep.subr.bf16.mxu0 %v677_v0  ;;  %486 = vmatprep.subr.bf16.mxu1 %v677_v0 }
  0x5b   :  { %475 = vmatpush3.bf16.msra.mxu0 %v534_v6  ;;  %487 = vmatpush3.bf16.msra.mxu1 %v538_v11 }
  0x5c   :  { %500 = vmatprep.subr.bf16.mxu0 %v677_v0  ;;  %488 = vmatprep.subr.bf16.mxu1 %v677_v0 }
  0x5e   :  { %477 = vmatmul.mubr.msk.bf16.vlgmr.msra.gmra.mrb[0].mxu0 %vm125_vm1, %v85_v10 }
  0x5f   :  { %516 = vmatprep.mubr.msk.bf16.mxu0 %vm678_vm0, %v677_v0  ;;  %489 = vmatpush3.bf16.msra.mxu1 %v539_v12 }
  0x60   :  { %490 = vmatprep.subr.bf16.mxu1 %v677_v0  ;;  %501 = vmatpush3.bf16.msra.mxu0 %v543_v16 }
  0x61   :  { %502 = vmatprep.subr.bf16.mxu0 %v677_v0 }
  0x63   :  { %491 = vmatpush3.bf16.msra.mxu1 %v540_v13 }
  0x64   :  { %492 = vmatprep.subr.bf16.mxu1 %v677_v0  ;;  %503 = vmatpush3.bf16.msra.mxu0 %v544_v17 }
  0x65   :  { %504 = vmatprep.subr.bf16.mxu0 %v677_v0 }
  0x67   :  { %493 = vmatpush3.bf16.msra.mxu1 %v541_v14 }
  0x68   :  { %494 = vmatprep.subr.bf16.mxu1 %v677_v0  ;;  %505 = vmatpush3.bf16.msra.mxu0 %v545_v18 }
  0x69   :  { %506 = vmatprep.subr.bf16.mxu0 %v677_v0 }
  0x6b   :  { %495 = vmatpush3.bf16.msra.mxu1 %v542_v15 }
  0x6c   :  { %507 = vmatpush3.bf16.msra.mxu0 %v546_v19 }
  0x6d   :  { %508 = vmatprep.subr.bf16.mxu0 %v677_v0 }
  0x70   :  { %509 = vmatpush3.bf16.msra.mxu0 %v547_v20 }
  0x71   :  { %510 = vmatprep.subr.bf16.mxu0 %v677_v0 }
  0x74   :  { %511 = vmatpush3.bf16.msra.mxu0 %v548_v21 }
  0x75   :  { %512 = vmatprep.subr.bf16.mxu0 %v677_v0 }
  0x78   :  { %513 = vmatpush3.bf16.msra.mxu0 %v549_v32 }
  0x79   :  { %514 = vmatprep.subr.bf16.mxu0 %v677_v0 }
  0x7c   :  { %515 = vmatpush3.bf16.msra.mxu0 %v550_v33 }
 0x131   :  { %v163_v23 = vpop.f32.mrb[0].mxu0 }
 0x132   :  { %v164_v24 = vadd.f32 %v421_v22, %v163_v23  ;;  %v478_v25 = vpop.f32.mrb[1].mxu0 }
 0x133   :  { %v166_v26 = vpop.f32.mrb[2].mxu0 }
 0x134   :  { %v167_v27 = vadd.f32 %v421_v22, %v166_v26  ;;  %v479_v28 = vpop.f32.mrb[3].mxu0  ;;  %v170_v29 = vmax.f32 %v164_v24, 0.0 }
 0x136   :  { %v171_v30 = vmax.f32 %v167_v27, 0.0 }
 0x138   :  { %v172_v31 = vpack.c.bf16 %v171_v30, %v170_v29 }
 0x13a   :  { %497 = vmatmul.mubr.bf16.vlgmr.msra.gmra.mrb[0].mxu1 %v172_v31 }
 0x20d   :  { %v278_v35 = vpop.f32.mrb[0].mxu1 }
 0x20e   :  { %v279_v36 = vadd.f32 %v427_v34, %v278_v35  ;;  %v498_v37 = vpop.f32.mrb[1].mxu1 }
 0x20f   :  { %v281_v38 = vpop.f32.mrb[2].mxu1 }
 0x210   :  { %v282_v39 = vadd.f32 %v427_v34, %v281_v38  ;;  %v499_v40 = vpop.f32.mrb[3].mxu1  ;;  %v285_v41 = vmax.f32 %v279_v36, 0.0 }
 0x212   :  { %v286_v42 = vmax.f32 %v282_v39, 0.0 }
 0x214   :  { %v287_v43 = vpack.c.bf16 %v286_v42, %v285_v41 }
 0x216   :  { %517 = vmatmul.mubr.bf16.vlgmr.msra.gmra.mrb[4].mxu0 %v287_v43 }
 0x2e9   :  { %v393_v45 = vpop.f32.mrb[4].mxu0 }
 0x2ea   :  { %v394_v46 = vadd.f32 %v436_v44, %v393_v45  ;;  %v518_v47 = vpop.f32.mrb[5].mxu0 }
 0x2eb   :  { %v396_v48 = vpop.f32.mrb[6].mxu0 }
 0x2ec   :  { %400 = vst [vmem:[#allocation10] sm:$0xff] %v394_v46  ;;  %v397_v49 = vadd.f32 %v436_v44, %v396_v48  ;;  %v519_v50 = vpop.f32.mrb[7].mxu0 }
 0x2ee   :  { %401 = vst [vmem:[#allocation10 + $0x8] sm:$0xff] %v397_v49 }
 0x2ef   :  { %406 = vsyncadd [#allocation4], 224  ;;  %s679_s4 = smov [#allocation10]  }
 0x2f0   :  { %s407_s10 = sshll.u32 %s679_s4, 4  ;;  %s408_s10 = int_to_ptr.vmem [resolvable:$true] %s407_s10 }
 0x2f1   :  { %s639_s13 = scalar_lea.vmem %s408_s10, 32  ;;  %s643_s14 = scalar_lea.vmem %s408_s10, 256 }
 0x2f2   :  { %p640_p4 = scmp.ne.s32.totalorder %s408_s10, %s639_s13  ;;  %p644_p5 = scmp.lt.s32.totalorder %s408_s10, %s408_s10 }
 0x2f3   :  { %p645_p6 = scmp.lt.s32.totalorder %s643_s14, %s639_s13 }
 0x2f5   :  { %p646_p7 = por %p645_p6, %p644_p5 }
 0x2f7   :  { %p647_p8 = pnand %p646_p7, %p640_p4 }
 0x2f9   :  { %650 = shalt.err (!%p647_p8)
}
 0x2fa   :  { %s651_s17 = scalar_lea.hbm %s844_s7, 32 }
 0x2fb   :  { %p652_p9 = scmp.ne.s32.totalorder %s844_s7, %s651_s17  ;;  %p655_p10 = scmp.lt.u32.totalorder %s651_s17, %s844_s7 }
 0x2fd   :  { %p657_p11 = pnand %p655_p10, %p652_p9 }
 0x2ff   :  { %660 = shalt.err (!%p657_p11)
}
 0x300   :  { %413 = dma.vmem_to_hbm [thread:$0]  %s408_s10, 32, %s844_s7, [#allocation4], %s673_s25, %s673_s25, %s674_s26  }
 0x301   :  { %667 = dma.done.wait [#allocation4], 256  }
 0x302   :  { %668 = vsyncadd [#allocation4], 4294967040 }
 0x303   :  { %417 = vsyncpa [#allocation3], 1 }
 0x304   :  { %418 = vsyncpa [#allocation6], 1 }
 0x305   :  { %419 = vsyncpa [#allocation9], 1 }
 0x306   :  { %420 = vsyncpa [#allocation4], 1 }

</bundles_post_ra>
